<compile_context>
chip_gen: v7x
topology: tpu7x:2x2x1
jax: 0.10.0
libtpu: 0.0.40
codegen_flags: <defaults>
</compile_context>

<pallas_src>
import functools
import math

import jax
import jax.numpy as jnp
from jax.experimental import pallas as pl
from jax.experimental.pallas import tpu as pltpu

_LANE = 128
_MAX_COLS = 8192
_TARGET_BLOCK_BYTES = 2 * 1024 * 1024  # ~2 MiB per input block


def _self_stabilizer_kernel(p_ref, x_ref, o_ref, *, steepness):
    # p_ref: (1, 1) f32 raw parameter; x_ref / o_ref: (row_tile, cols) tiles.
    p = p_ref[...].astype(jnp.float32)                       # (1, 1)
    bx = p * steepness
    # softplus(p, beta=steepness), with PyTorch's threshold=20 linear region.
    scale = jnp.where(bx > 20.0, p, jnp.log1p(jnp.exp(bx)) * (1.0 / steepness))
    x = x_ref[...].astype(jnp.float32)
    o_ref[...] = (x * scale).astype(o_ref.dtype)             # (1,1) broadcasts


def _choose_cols(num_elems):
    """Largest multiple-of-128 divisor of num_elems, capped at _MAX_COLS."""
    hi = min(num_elems, _MAX_COLS)
    for mult in range(hi // _LANE, 0, -1):
        c = _LANE * mult
        if num_elems % c == 0:
            return c
    return _LANE


@functools.partial(jax.jit, static_argnames=("steepness",))
def self_stabilizer_forward(x, param, steepness: float = 4.0):
    """out = softplus(param, beta=steepness) * x   (shape/dtype preserved)."""
    orig_shape = x.shape
    dtype = x.dtype
    n_elems = x.size

    flat = x.reshape(-1)
    pad = (-n_elems) % _LANE
    if pad:
        # Ragged element counts: pad to a lane multiple so stores stay unmasked.
        flat = jnp.pad(flat, (0, pad))
    n_padded = n_elems + pad

    cols = _choose_cols(n_padded)
    rows = n_padded // cols

    itemsize = jnp.dtype(dtype).itemsize
    rt = max(8, (_TARGET_BLOCK_BYTES // (cols * itemsize)) // 8 * 8)
    row_tile = rows if rows <= rt else rt  # full-dim block is always legal

    x2d = flat.reshape(rows, cols)
    p2d = jnp.asarray(param, jnp.float32).reshape(1, 1)

    grid = (pl.cdiv(rows, row_tile),)
    out2d = pl.pallas_call(
        functools.partial(_self_stabilizer_kernel, steepness=float(steepness)),
        out_shape=jax.ShapeDtypeStruct((rows, cols), dtype),
        grid_spec=pltpu.PrefetchScalarGridSpec(
            num_scalar_prefetch=0,
            grid=grid,
            in_specs=[
                pl.BlockSpec((1, 1), lambda i: (0, 0)),
                pl.BlockSpec((row_tile, cols), lambda i: (i, 0)),
            ],
            out_specs=pl.BlockSpec((row_tile, cols), lambda i: (i, 0)),
        ),
        compiler_params=pltpu.CompilerParams(
            dimension_semantics=("parallel",),
            vmem_limit_bytes=32 * 1024 * 1024,
        ),
    )(p2d, x2d)

    out_flat = out2d.reshape(-1)
    if pad:
        out_flat = out_flat[:n_elems]
    return out_flat.reshape(orig_shape)


class SelfStabilizer:
    """JAX/Pallas port of the PyTorch SelfStabilizer module."""

    def __init__(self, steepness: float = 4.0):
        self.steepness = float(steepness)
        # Initialized so that softplus(param, beta=steepness) == 1.0 exactly.
        self.param = jnp.float32(math.log(math.exp(steepness) - 1.0) / steepness)

    def __call__(self, x):
        return self_stabilizer_forward(x, self.param, steepness=self.steepness)


def _reference_self_stabilizer(x, param, steepness=4.0):
    # Pure-JAX mirror of F.softplus(param, beta=steepness) * x.
    scale = jnp.logaddexp(0.0, param * steepness) / steepness
    return scale.astype(jnp.float32) * x


if __name__ == "__main__":
    key = jax.random.PRNGKey(0)
    x = jax.random.normal(key, (2, 4, 16, 16), dtype=jnp.float32)

    layer = SelfStabilizer(steepness=4.0)
    out = jax.block_until_ready(layer(x))

    assert out.shape == x.shape and out.dtype == x.dtype
    ref = _reference_self_stabilizer(x, layer.param, layer.steepness)
    assert jnp.allclose(out, ref, atol=1e-5, rtol=1e-5), "mismatch vs reference"
    # At init the scale is exactly 1.0, so the forward is (numerically) identity.
    assert jnp.allclose(out, x, atol=1e-5, rtol=1e-5), "init scale should be 1.0"

    # Second check with a "trained" (perturbed) parameter, where scale != 1.
    layer.param = layer.param + jnp.float32(0.3)
    out2 = jax.block_until_ready(layer(x))
    ref2 = _reference_self_stabilizer(x, layer.param, layer.steepness)
    assert jnp.allclose(out2, ref2, atol=1e-5, rtol=1e-5), "mismatch (perturbed param)"

    print("KERNEL_OK")
</pallas_src>

<mosaic_0001>
module attributes {stable_mosaic.version = 11 : i64} {
  func.func @_self_stabilizer_kernel(%arg0: i32, %arg1: memref<1x1xf32, #tpu.memory_space<vmem>>, %arg2: memref<1x2048xf32, #tpu.memory_space<vmem>>, %arg3: memref<1x2048xf32, #tpu.memory_space<vmem>>) attributes {dimension_semantics = [#tpu.dimension_semantics<parallel>], iteration_bounds = array<i64: 1>, scalar_prefetch = 0 : i64, scratch_operands = 0 : i64, tpu.core_type = #tpu.core_type<tc>, window_params = [{pipeline_mode = #tpu.pipeline_mode<synchronous>, transform_indices = @transform_0, window_bounds = array<i64: 1, 1>}, {transform_indices = @transform_1, window_bounds = array<i64: 1, 2048>}, {transform_indices = @transform_2, window_bounds = array<i64: 1, 2048>}]} {
    %c0 = arith.constant 0 : index
    %c0_0 = arith.constant 0 : index
    %0 = vector.load %arg1[%c0, %c0_0] : memref<1x1xf32, #tpu.memory_space<vmem>>, vector<1x1xf32>
    %cst = arith.constant 4.000000e+00 : f32
    %1 = vector.broadcast %cst : f32 to vector<1x1xf32>
    %2 = arith.mulf %0, %1 : vector<1x1xf32>
    %cst_1 = arith.constant 2.000000e+01 : f32
    %3 = vector.broadcast %cst_1 : f32 to vector<1x1xf32>
    %4 = arith.cmpf ogt, %2, %3 : vector<1x1xf32>
    %5 = math.exp %2 : vector<1x1xf32>
    %6 = math.log1p %5 : vector<1x1xf32>
    %cst_2 = arith.constant 2.500000e-01 : f32
    %7 = vector.broadcast %cst_2 : f32 to vector<1x1xf32>
    %8 = arith.mulf %6, %7 : vector<1x1xf32>
    %9 = arith.select %4, %0, %8 : vector<1x1xi1>, vector<1x1xf32>
    %c0_3 = arith.constant 0 : index
    %c0_4 = arith.constant 0 : index
    %10 = vector.load %arg2[%c0_3, %c0_4] : memref<1x2048xf32, #tpu.memory_space<vmem>>, vector<1x2048xf32>
    %11 = vector.broadcast %9 : vector<1x1xf32> to vector<1x2048xf32>
    %12 = arith.mulf %10, %11 : vector<1x2048xf32>
    %c0_5 = arith.constant 0 : index
    %c0_6 = arith.constant 0 : index
    %13 = vector.load %arg3[%c0_5, %c0_6] : memref<1x2048xf32, #tpu.memory_space<vmem>>, vector<1x2048xf32>
    tpu.vector_store %arg3[%c0_5, %c0_6], %12 {strides = array<i32>} : memref<1x2048xf32, #tpu.memory_space<vmem>>, vector<1x2048xf32>,
    return
  }
  func.func @transform_0(%arg0: i32) -> (i32, i32) {
    %c0_i32 = arith.constant 0 : i32
    %c0_i32_0 = arith.constant 0 : i32
    %c0_i32_1 = arith.constant 0 : i32
    return %c0_i32, %c0_i32_0 : i32, i32
  }
  func.func @transform_1(%arg0: i32) -> (i32, i32) {
    %c0_i32 = arith.constant 0 : i32
    %c0_i32_0 = arith.constant 0 : i32
    return %arg0, %c0_i32 : i32, i32
  }
  func.func @transform_2(%arg0: i32) -> (i32, i32) {
    %c0_i32 = arith.constant 0 : i32
    %c0_i32_0 = arith.constant 0 : i32
    return %arg0, %c0_i32 : i32, i32
  }
}

</mosaic_0001>

<bundles_post_ra>
// kernel: self_stabilizer_forward.1
= control target key start
LH: loop header
LB: loop body
LE: loop exit
PB: predicated region body
PF: predicated region fallthrough
CT: control target
= control target key end

     0   :  { %v54_v0 = vmov 0   ;;  %v36_v16 = vlaneseq  ;;  %s85_s0 = inlined_call_operand.<no memory space> [shape: f32[1,1], index: 0, kind: input, shape index: {}]   ;;  %s86_s1 = inlined_call_operand.vmem [shape: f32[1,2048], index: 1, kind: input, shape index: {}]   ;;  %s87_s2 = inlined_call_operand.vmem [shape: f32[1,2048], index: 2, kind: output, shape index: {}]  }
   0x1   :  { %49 = vset.pattern.permute.xlu0 %v54_v0  ;;  %v7_v1 = vstv %s85_s0  ;;  %v29_v19 = vld [vmem:[%s86_s1] sm:$0xff]  ;;  %v30_v20 = vld [vmem:[%s86_s1 + $0x8] sm:$0xff] }
   0x2   :  { %8 = vst [vmem:[#allocation2] sm:$0x1] %v7_v1  ;;  %v37_v17 = vshrl.u32 %v36_v16, 7 }
   0x4   :  { %v38_v18 = vsub.s32 0, %v37_v17 }
   0x9   :  { %v13_v2 = vld [vmem:[#allocation2] sm:$0x1] }
   0xa   :  { %v14_v3 = vmul.f32 4.0, %v13_v2 }
   0xc   :  { %v16_v4 = vmul.f32 1.442695, %v14_v3  ;;  %vm15_vm1 = vcmp.gt.f32.partialorder %v14_v3, 20.0 }
   0xe   :  { %50 = vpow2.f32 %v16_v4 }
  0x18   :  { %v51_v5 = vpop.eup %50 }
  0x19   :  { %v18_v6 = vadd.f32 1.0, %v51_v5  ;;  %v21_v7 = vmul.f32 -0.5, %v51_v5  ;;  %v24_v9 = vand.u32 2147483647, %v51_v5 }
  0x1b   :  { %52 = vlog2.f32 %v18_v6  ;;  %v22_v8 = vadd.f32 1.0, %v21_v7  ;;  %vm25_vm0 = vcmp.lt.f32.partialorder %v24_v9, 0.0004427343 }
  0x1d   :  { %v23_v10 = vmul.f32 %v51_v5, %v22_v8 }
  0x25   :  { %v53_v11 = vpop.eup %52 }
  0x26   :  { %v20_v12 = vmul.f32 0.6931472, %v53_v11 }
  0x28   :  { %v26_v13 = vsel %vm25_vm0, %v23_v10, %v20_v12 }
  0x29   :  { %v27_v14 = vmul.f32 0.25, %v26_v13 }
  0x2b   :  { %v28_v15 = vsel %vm15_vm1, %v13_v2, %v27_v14 }
  0x2c   :  { %33 = vperm.xlu0 %49, %v28_v15  }
  0xab   :  { %v34_v21 = vpop.permute.xlu0 %33 }
  0xac   :  { %v39_v22 = vrot.slane %v34_v21, %v38_v18 }
  0xae   :  { %v40_v23 = vmul.f32 %v39_v22, %v29_v19  ;;  %v41_v24 = vmul.f32 %v39_v22, %v30_v20 }
  0xb0   :  { %42 = vst [vmem:[%s87_s2] sm:$0xff] %v40_v23  ;;  %43 = vst [vmem:[%s87_s2 + $0x8] sm:$0xff] %v41_v24 }

</bundles_post_ra>
